<compile_context>
chip_gen: v7x
topology: tpu7x:2x2x1
jax: 0.10.0
libtpu: 0.0.40
codegen_flags: <defaults>
</compile_context>

<pallas_src>
import jax
import jax.numpy as jnp
from jax import lax
from jax.experimental import pallas as pl
from jax.experimental.pallas import tpu as pltpu

H = W = 16                    # stand-in for the 224x224 center crop
HW = H * W
C = 3                         # RGB (post-ToTensor)
C_PAD = 8                     # channels padded to one full sublane tile
K = 3                         # conv kernel size
KKC_PAD = K * K * C_PAD       # 72: contraction dim of the conv matmul (8-aligned)
CMID = 32                     # conv-stem output channels
NUM_CLASSES = 16              # stand-in for the 1000 ImageNet classes

IMAGENET_MEAN = (0.485, 0.456, 0.406)
IMAGENET_STD = (0.229, 0.224, 0.225)


# ---------------------------------------------------------------------------
# Single fused kernel: normalize -> im2col (roll+mask) -> conv -> ReLU ->
#                      FC head -> global avg pool -> softmax
# ---------------------------------------------------------------------------
def _fused_forward_kernel(x_ref, wconv_ref, bconv_ref, wfc_ref, bfc_ref, o_ref):
    # ---- transforms.Normalize, in registers (mean/std are module literals) --
    x = x_ref[...]                                                  # (C_PAD, HW)
    c_idx = lax.broadcasted_iota(jnp.int32, (C_PAD, 1), 0)
    mean = jnp.where(c_idx == 0, IMAGENET_MEAN[0],
           jnp.where(c_idx == 1, IMAGENET_MEAN[1],
           jnp.where(c_idx == 2, IMAGENET_MEAN[2], 0.0)))
    inv_std = jnp.where(c_idx == 0, 1.0 / IMAGENET_STD[0],
              jnp.where(c_idx == 1, 1.0 / IMAGENET_STD[1],
              jnp.where(c_idx == 2, 1.0 / IMAGENET_STD[2], 0.0)))
    xn = (x - mean) * inv_std            # padded channel rows stay exactly 0

    # ---- in-kernel im2col: 9 shifted tap views via lane rolls + border masks.
    #      Zeroing invalid positions == zero-padding the *normalized* image.
    p = lax.broadcasted_iota(jnp.int32, (C_PAD, HW), 1)   # flat pixel index
    col = p & (W - 1)                                     # j = p % W (W is 2^k)
    slabs = []
    for di in (-1, 0, 1):
        for dj in (-1, 0, 1):
            off = di * W + dj
            v = xn if off == 0 else pltpu.roll(xn, (-off) % HW, axis=1)
            conds = []
            if di == -1:
                conds.append(p >= W)                      # i - 1 >= 0
            if di == 1:
                conds.append(p < (H - 1) * W)             # i + 1 <= H - 1
            if dj == -1:
                conds.append(col >= 1)                    # j - 1 >= 0
            if dj == 1:
                conds.append(col < (W - 1))               # j + 1 <= W - 1
            if conds:
                m = conds[0]
                for cnd in conds[1:]:
                    m = jnp.logical_and(m, cnd)
                v = jnp.where(m, v, 0.0)
            slabs.append(v)
    x_stack = jnp.concatenate(slabs, axis=0)              # (KKC_PAD, HW) = (72, 256)

    # ---- conv stem: one MXU matmul, lane-dense channels-on-sublanes output --
    feat = jnp.dot(wconv_ref[...], x_stack,
                   preferred_element_type=jnp.float32)    # (CMID, HW)
    feat = jnp.maximum(feat + bconv_ref[...], 0.0)        # bias bcast over lanes, ReLU

    # ---- FC head per pixel (MXU) then global-avg-pool as a lane reduction.
    #      (pool and FC are both linear, so FC∘pool == pool∘FC on ReLU(feat))
    cls_map = jnp.dot(wfc_ref[...], feat,
                      preferred_element_type=jnp.float32)            # (NCLS, HW)
    logits = (jnp.sum(cls_map, axis=1, keepdims=True) * (1.0 / HW)
              + bfc_ref[...])                                        # (NCLS, 1)

    # ---- softmax over classes (matches `.squeeze(0).softmax(0)`) ------------
    m = jnp.max(logits, axis=0, keepdims=True)
    e = jnp.exp(logits - m)
    s = jnp.sum(e, axis=0, keepdims=True)
    o_ref[...] = e * pl.reciprocal(s, approx=True)        # EUP reciprocal


def _fused_call(x, w_conv, b_conv, w_fc_t, b_fc):
    return pl.pallas_call(
        _fused_forward_kernel,
        out_shape=jax.ShapeDtypeStruct((NUM_CLASSES, 1), jnp.float32),
        grid=(1,),
        in_specs=[
            pl.BlockSpec((C_PAD, HW), lambda i: (0, 0)),
            pl.BlockSpec((CMID, KKC_PAD), lambda i: (0, 0)),
            pl.BlockSpec((CMID, 1), lambda i: (0, 0)),
            pl.BlockSpec((NUM_CLASSES, CMID), lambda i: (0, 0)),
            pl.BlockSpec((NUM_CLASSES, 1), lambda i: (0, 0)),
        ],
        out_specs=pl.BlockSpec((NUM_CLASSES, 1), lambda i: (0, 0)),
        compiler_params=pltpu.CompilerParams(
            # TODO(synk): the module's forward takes a single image; with a
            # batch, a leading "parallel" grid axis would let v7x's two
            # TensorCores split the work.
            dimension_semantics=("arbitrary",)),
    )(x, w_conv, b_conv, w_fc_t, b_fc)


# ---------------------------------------------------------------------------
# Host-side param packing (one-time, tile-aligned layouts) and thin wrapper
# ---------------------------------------------------------------------------
def pack_params(w_conv, b_conv, w_fc, b_fc):
    """Repack params once into kernel-friendly layouts (padding C 3->8)."""
    w_conv_p = (jnp.zeros((CMID, K * K, C_PAD), jnp.float32)
                .at[:, :, :C].set(w_conv)
                .reshape(CMID, KKC_PAD))          # column index = tap*C_PAD + c
    return {
        "w_conv": w_conv_p,                       # (CMID, 72)
        "b_conv": b_conv.reshape(CMID, 1),        # (CMID, 1)
        "w_fc_t": jnp.transpose(w_fc),            # (NUM_CLASSES, CMID)
        "b_fc": b_fc.reshape(NUM_CLASSES, 1),     # (NUM_CLASSES, 1)
    }


@jax.jit
def my_classifier_forward(img_hwc, params):
    """Mirrors MyClassifier.forward: preprocess -> model(x).squeeze(0).softmax(0)."""
    # Layout plumbing only: (H, W, C) -> (C_pad, H*W), channels on sublanes.
    x_cf = jnp.transpose(img_hwc, (2, 0, 1)).reshape(C, HW)
    x_pad = jnp.zeros((C_PAD, HW), jnp.float32).at[:C, :].set(x_cf)
    probs = _fused_call(x_pad, params["w_conv"], params["b_conv"],
                        params["w_fc_t"], params["b_fc"])     # (NUM_CLASSES, 1)
    return probs[:, 0]                                        # .squeeze(0)


def reference_forward(img_hwc, w_conv, b_conv, w_fc, b_fc):
    """Pure-JAX reference for the consistency check."""
    mean = jnp.array(IMAGENET_MEAN, dtype=jnp.float32)
    std = jnp.array(IMAGENET_STD, dtype=jnp.float32)
    xn = (img_hwc - mean) / std
    xp = jnp.pad(xn, ((1, 1), (1, 1), (0, 0)))                # pad in normalized space
    cols = []
    for di in range(K):
        for dj in range(K):
            cols.append(xp[di:di + H, dj:dj + W, :])
    patches = jnp.concatenate(cols, axis=-1).reshape(HW, K * K * C)
    w_flat = w_conv.reshape(CMID, K * K * C).T                # tap-major, channel-minor
    feat = jnp.maximum(patches @ w_flat + b_conv, 0.0)        # (HW, CMID)
    pooled = jnp.mean(feat, axis=0)                           # global average pool
    logits = pooled @ w_fc + b_fc
    return jax.nn.softmax(logits, axis=-1)


if __name__ == "__main__":
    key = jax.random.PRNGKey(0)
    k_img, k_wc, k_bc, k_wf, k_bf = jax.random.split(key, 5)

    # Deterministic "post-ToTensor" image in [0, 1] and synthetic weights.
    img = jax.random.uniform(k_img, (H, W, C), dtype=jnp.float32)
    w_conv = 0.1 * jax.random.normal(k_wc, (CMID, K * K, C), dtype=jnp.float32)
    b_conv = 0.1 * jax.random.normal(k_bc, (CMID,), dtype=jnp.float32)
    w_fc = 0.1 * jax.random.normal(k_wf, (CMID, NUM_CLASSES), dtype=jnp.float32)
    b_fc = 0.1 * jax.random.normal(k_bf, (NUM_CLASSES,), dtype=jnp.float32)
    params = pack_params(w_conv, b_conv, w_fc, b_fc)

    out = my_classifier_forward(img, params)
    jax.block_until_ready(out)

    ref = reference_forward(img, w_conv, b_conv, w_fc, b_fc)
    assert out.shape == (NUM_CLASSES,)
    # Tolerances allow for the EUP approximate reciprocal in the softmax.
    assert jnp.allclose(jnp.sum(out), 1.0, atol=5e-3)
    assert int(jnp.argmax(out)) == int(jnp.argmax(ref))
    assert jnp.allclose(out, ref, atol=1e-3, rtol=1e-2)

    print("KERNEL_OK")
</pallas_src>

<mosaic_0001>
module attributes {stable_mosaic.version = 11 : i64} {
  func.func @_fused_forward_kernel(%arg0: i32, %arg1: memref<8x256xf32, #tpu.memory_space<vmem>>, %arg2: memref<32x72xf32, #tpu.memory_space<vmem>>, %arg3: memref<32x1xf32, #tpu.memory_space<vmem>>, %arg4: memref<16x32xf32, #tpu.memory_space<vmem>>, %arg5: memref<16x1xf32, #tpu.memory_space<vmem>>, %arg6: memref<16x1xf32, #tpu.memory_space<vmem>>) attributes {dimension_semantics = [#tpu.dimension_semantics<arbitrary>], iteration_bounds = array<i64: 1>, scalar_prefetch = 0 : i64, scratch_operands = 0 : i64, tpu.core_type = #tpu.core_type<tc>, window_params = [{pipeline_mode = #tpu.pipeline_mode<synchronous>, transform_indices = @transform_0, window_bounds = array<i64: 8, 256>}, {pipeline_mode = #tpu.pipeline_mode<synchronous>, transform_indices = @transform_1, window_bounds = array<i64: 32, 72>}, {pipeline_mode = #tpu.pipeline_mode<synchronous>, transform_indices = @transform_2, window_bounds = array<i64: 32, 1>}, {pipeline_mode = #tpu.pipeline_mode<synchronous>, transform_indices = @transform_3, window_bounds = array<i64: 16, 32>}, {pipeline_mode = #tpu.pipeline_mode<synchronous>, transform_indices = @transform_4, window_bounds = array<i64: 16, 1>}, {pipeline_mode = #tpu.pipeline_mode<synchronous>, transform_indices = @transform_5, window_bounds = array<i64: 16, 1>}]} {
    %c0 = arith.constant 0 : index
    %c0_0 = arith.constant 0 : index
    %0 = vector.load %arg1[%c0, %c0_0] : memref<8x256xf32, #tpu.memory_space<vmem>>, vector<8x256xf32>
    %1 = tpu.iota {dimensions = array<i32: 0>} : vector<8x1xi32>
    %c0_i32 = arith.constant 0 : i32
    %2 = vector.broadcast %c0_i32 : i32 to vector<8x1xi32>
    %3 = arith.cmpi eq, %1, %2 : vector<8x1xi32>
    %c1_i32 = arith.constant 1 : i32
    %4 = vector.broadcast %c1_i32 : i32 to vector<8x1xi32>
    %5 = arith.cmpi eq, %1, %4 : vector<8x1xi32>
    %c2_i32 = arith.constant 2 : i32
    %6 = vector.broadcast %c2_i32 : i32 to vector<8x1xi32>
    %7 = arith.cmpi eq, %1, %6 : vector<8x1xi32>
    %cst = arith.constant 4.060000e-01 : f32
    %cst_1 = arith.constant 0.000000e+00 : f32
    %8 = vector.broadcast %cst : f32 to vector<8x1xf32>
    %9 = vector.broadcast %cst_1 : f32 to vector<8x1xf32>
    %10 = arith.select %7, %8, %9 : vector<8x1xi1>, vector<8x1xf32>
    %cst_2 = arith.constant 4.560000e-01 : f32
    %11 = vector.broadcast %cst_2 : f32 to vector<8x1xf32>
    %12 = arith.select %5, %11, %10 : vector<8x1xi1>, vector<8x1xf32>
    %cst_3 = arith.constant 4.850000e-01 : f32
    %13 = vector.broadcast %cst_3 : f32 to vector<8x1xf32>
    %14 = arith.select %3, %13, %12 : vector<8x1xi1>, vector<8x1xf32>
    %c0_i32_4 = arith.constant 0 : i32
    %15 = vector.broadcast %c0_i32_4 : i32 to vector<8x1xi32>
    %16 = arith.cmpi eq, %1, %15 : vector<8x1xi32>
    %c1_i32_5 = arith.constant 1 : i32
    %17 = vector.broadcast %c1_i32_5 : i32 to vector<8x1xi32>
    %18 = arith.cmpi eq, %1, %17 : vector<8x1xi32>
    %c2_i32_6 = arith.constant 2 : i32
    %19 = vector.broadcast %c2_i32_6 : i32 to vector<8x1xi32>
    %20 = arith.cmpi eq, %1, %19 : vector<8x1xi32>
    %cst_7 = arith.constant 4.44444466 : f32
    %cst_8 = arith.constant 0.000000e+00 : f32
    %21 = vector.broadcast %cst_7 : f32 to vector<8x1xf32>
    %22 = vector.broadcast %cst_8 : f32 to vector<8x1xf32>
    %23 = arith.select %20, %21, %22 : vector<8x1xi1>, vector<8x1xf32>
    %cst_9 = arith.constant 4.46428585 : f32
    %24 = vector.broadcast %cst_9 : f32 to vector<8x1xf32>
    %25 = arith.select %18, %24, %23 : vector<8x1xi1>, vector<8x1xf32>
    %cst_10 = arith.constant 4.36681223 : f32
    %26 = vector.broadcast %cst_10 : f32 to vector<8x1xf32>
    %27 = arith.select %16, %26, %25 : vector<8x1xi1>, vector<8x1xf32>
    %28 = vector.broadcast %14 : vector<8x1xf32> to vector<8x256xf32>
    %29 = arith.subf %0, %28 : vector<8x256xf32>
    %30 = vector.broadcast %27 : vector<8x1xf32> to vector<8x256xf32>
    %31 = arith.mulf %29, %30 : vector<8x256xf32>
    %32 = tpu.iota {dimensions = array<i32: 1>} : vector<8x256xi32>
    %c15_i32 = arith.constant 15 : i32
    %33 = vector.broadcast %c15_i32 : i32 to vector<8x256xi32>
    %34 = arith.andi %32, %33 : vector<8x256xi32>
    %c17_i32 = arith.constant 17 : i32
    %35 = tpu.dynamic_rotate %31 by %c17_i32 dim 1 : vector<8x256xf32>, i32 -> vector<8x256xf32>
    %c16_i32 = arith.constant 16 : i32
    %36 = vector.broadcast %c16_i32 : i32 to vector<8x256xi32>
    %37 = arith.cmpi sge, %32, %36 : vector<8x256xi32>
    %c1_i32_11 = arith.constant 1 : i32
    %38 = vector.broadcast %c1_i32_11 : i32 to vector<8x256xi32>
    %39 = arith.cmpi sge, %34, %38 : vector<8x256xi32>
    %40 = arith.andi %37, %39 : vector<8x256xi1>
    %cst_12 = arith.constant 0.000000e+00 : f32
    %41 = vector.broadcast %cst_12 : f32 to vector<8x256xf32>
    %42 = arith.select %40, %35, %41 : vector<8x256xi1>, vector<8x256xf32>
    %c16_i32_13 = arith.constant 16 : i32
    %43 = tpu.dynamic_rotate %31 by %c16_i32_13 dim 1 : vector<8x256xf32>, i32 -> vector<8x256xf32>
    %c16_i32_14 = arith.constant 16 : i32
    %44 = vector.broadcast %c16_i32_14 : i32 to vector<8x256xi32>
    %45 = arith.cmpi sge, %32, %44 : vector<8x256xi32>
    %cst_15 = arith.constant 0.000000e+00 : f32
    %46 = vector.broadcast %cst_15 : f32 to vector<8x256xf32>
    %47 = arith.select %45, %43, %46 : vector<8x256xi1>, vector<8x256xf32>
    %c15_i32_16 = arith.constant 15 : i32
    %48 = tpu.dynamic_rotate %31 by %c15_i32_16 dim 1 : vector<8x256xf32>, i32 -> vector<8x256xf32>
    %c16_i32_17 = arith.constant 16 : i32
    %49 = vector.broadcast %c16_i32_17 : i32 to vector<8x256xi32>
    %50 = arith.cmpi sge, %32, %49 : vector<8x256xi32>
    %c15_i32_18 = arith.constant 15 : i32
    %51 = vector.broadcast %c15_i32_18 : i32 to vector<8x256xi32>
    %52 = arith.cmpi slt, %34, %51 : vector<8x256xi32>
    %53 = arith.andi %50, %52 : vector<8x256xi1>
    %cst_19 = arith.constant 0.000000e+00 : f32
    %54 = vector.broadcast %cst_19 : f32 to vector<8x256xf32>
    %55 = arith.select %53, %48, %54 : vector<8x256xi1>, vector<8x256xf32>
    %c1_i32_20 = arith.constant 1 : i32
    %56 = tpu.dynamic_rotate %31 by %c1_i32_20 dim 1 : vector<8x256xf32>, i32 -> vector<8x256xf32>
    %c1_i32_21 = arith.constant 1 : i32
    %57 = vector.broadcast %c1_i32_21 : i32 to vector<8x256xi32>
    %58 = arith.cmpi sge, %34, %57 : vector<8x256xi32>
    %cst_22 = arith.constant 0.000000e+00 : f32
    %59 = vector.broadcast %cst_22 : f32 to vector<8x256xf32>
    %60 = arith.select %58, %56, %59 : vector<8x256xi1>, vector<8x256xf32>
    %c255_i32 = arith.constant 255 : i32
    %61 = tpu.dynamic_rotate %31 by %c255_i32 dim 1 : vector<8x256xf32>, i32 -> vector<8x256xf32>
    %c15_i32_23 = arith.constant 15 : i32
    %62 = vector.broadcast %c15_i32_23 : i32 to vector<8x256xi32>
    %63 = arith.cmpi slt, %34, %62 : vector<8x256xi32>
    %cst_24 = arith.constant 0.000000e+00 : f32
    %64 = vector.broadcast %cst_24 : f32 to vector<8x256xf32>
    %65 = arith.select %63, %61, %64 : vector<8x256xi1>, vector<8x256xf32>
    %c241_i32 = arith.constant 241 : i32
    %66 = tpu.dynamic_rotate %31 by %c241_i32 dim 1 : vector<8x256xf32>, i32 -> vector<8x256xf32>
    %c240_i32 = arith.constant 240 : i32
    %67 = vector.broadcast %c240_i32 : i32 to vector<8x256xi32>
    %68 = arith.cmpi slt, %32, %67 : vector<8x256xi32>
    %c1_i32_25 = arith.constant 1 : i32
    %69 = vector.broadcast %c1_i32_25 : i32 to vector<8x256xi32>
    %70 = arith.cmpi sge, %34, %69 : vector<8x256xi32>
    %71 = arith.andi %68, %70 : vector<8x256xi1>
    %cst_26 = arith.constant 0.000000e+00 : f32
    %72 = vector.broadcast %cst_26 : f32 to vector<8x256xf32>
    %73 = arith.select %71, %66, %72 : vector<8x256xi1>, vector<8x256xf32>
    %c240_i32_27 = arith.constant 240 : i32
    %74 = tpu.dynamic_rotate %31 by %c240_i32_27 dim 1 : vector<8x256xf32>, i32 -> vector<8x256xf32>
    %c240_i32_28 = arith.constant 240 : i32
    %75 = vector.broadcast %c240_i32_28 : i32 to vector<8x256xi32>
    %76 = arith.cmpi slt, %32, %75 : vector<8x256xi32>
    %cst_29 = arith.constant 0.000000e+00 : f32
    %77 = vector.broadcast %cst_29 : f32 to vector<8x256xf32>
    %78 = arith.select %76, %74, %77 : vector<8x256xi1>, vector<8x256xf32>
    %c239_i32 = arith.constant 239 : i32
    %79 = tpu.dynamic_rotate %31 by %c239_i32 dim 1 : vector<8x256xf32>, i32 -> vector<8x256xf32>
    %c240_i32_30 = arith.constant 240 : i32
    %80 = vector.broadcast %c240_i32_30 : i32 to vector<8x256xi32>
    %81 = arith.cmpi slt, %32, %80 : vector<8x256xi32>
    %c15_i32_31 = arith.constant 15 : i32
    %82 = vector.broadcast %c15_i32_31 : i32 to vector<8x256xi32>
    %83 = arith.cmpi slt, %34, %82 : vector<8x256xi32>
    %84 = arith.andi %81, %83 : vector<8x256xi1>
    %cst_32 = arith.constant 0.000000e+00 : f32
    %85 = vector.broadcast %cst_32 : f32 to vector<8x256xf32>
    %86 = arith.select %84, %79, %85 : vector<8x256xi1>, vector<8x256xf32>
    %87 = tpu.concatenate %42, %47, %55, %60, %31, %65, %73, %78, %86 in 0 : vector<8x256xf32>, vector<8x256xf32>, vector<8x256xf32>, vector<8x256xf32>, vector<8x256xf32>, vector<8x256xf32>, vector<8x256xf32>, vector<8x256xf32>, vector<8x256xf32> -> vector<72x256xf32>
    %c0_33 = arith.constant 0 : index
    %c0_34 = arith.constant 0 : index
    %88 = vector.load %arg2[%c0_33, %c0_34] : memref<32x72xf32, #tpu.memory_space<vmem>>, vector<32x72xf32>
    %cst_35 = arith.constant dense<0.000000e+00> : vector<32x256xf32>
    %89 = tpu.matmul %88, %87, %cst_35 {dimension_numbers = #tpu.dot_dimension_numbers<[1], [0], [0], [1], [0, 0, 1, 1], [], []>} : vector<32x72xf32>, vector<72x256xf32>, vector<32x256xf32> -> vector<32x256xf32>
    %c0_36 = arith.constant 0 : index
    %c0_37 = arith.constant 0 : index
    %90 = vector.load %arg3[%c0_36, %c0_37] : memref<32x1xf32, #tpu.memory_space<vmem>>, vector<32x1xf32>
    %91 = vector.broadcast %90 : vector<32x1xf32> to vector<32x256xf32>
    %92 = arith.addf %89, %91 : vector<32x256xf32>
    %cst_38 = arith.constant 0.000000e+00 : f32
    %93 = vector.broadcast %cst_38 : f32 to vector<32x256xf32>
    %94 = arith.maximumf %92, %93 : vector<32x256xf32>
    %c0_39 = arith.constant 0 : index
    %c0_40 = arith.constant 0 : index
    %95 = vector.load %arg4[%c0_39, %c0_40] : memref<16x32xf32, #tpu.memory_space<vmem>>, vector<16x32xf32>
    %cst_41 = arith.constant dense<0.000000e+00> : vector<16x256xf32>
    %96 = tpu.matmul %95, %94, %cst_41 {dimension_numbers = #tpu.dot_dimension_numbers<[1], [0], [0], [1], [0, 0, 1, 1], [], []>} : vector<16x32xf32>, vector<32x256xf32>, vector<16x256xf32> -> vector<16x256xf32>
    %cst_42 = arith.constant dense<0.000000e+00> : vector<16xf32>
    %97 = vector.multi_reduction <add>, %96, %cst_42 [1] : vector<16x256xf32> to vector<16xf32>
    %98 = vector.shape_cast %97 : vector<16xf32> to vector<16x1xf32>
    %cst_43 = arith.constant 3.906250e-03 : f32
    %99 = vector.broadcast %cst_43 : f32 to vector<16x1xf32>
    %100 = arith.mulf %98, %99 : vector<16x1xf32>
    %c0_44 = arith.constant 0 : index
    %c0_45 = arith.constant 0 : index
    %101 = vector.load %arg5[%c0_44, %c0_45] : memref<16x1xf32, #tpu.memory_space<vmem>>, vector<16x1xf32>
    %102 = arith.addf %100, %101 : vector<16x1xf32>
    %cst_46 = arith.constant dense<0xFF800000> : vector<1xf32>
    %103 = vector.multi_reduction <maximumf>, %102, %cst_46 [0] : vector<16x1xf32> to vector<1xf32>
    %104 = vector.shape_cast %103 : vector<1xf32> to vector<1x1xf32>
    %105 = vector.broadcast %104 : vector<1x1xf32> to vector<16x1xf32>
    %106 = arith.subf %102, %105 : vector<16x1xf32>
    %107 = math.exp %106 : vector<16x1xf32>
    %cst_47 = arith.constant dense<0.000000e+00> : vector<1xf32>
    %108 = vector.multi_reduction <add>, %107, %cst_47 [0] : vector<16x1xf32> to vector<1xf32>
    %109 = vector.shape_cast %108 : vector<1xf32> to vector<1x1xf32>
    %110 = tpu.reciprocal %109 {approx = true} : vector<1x1xf32> -> vector<1x1xf32>
    %111 = vector.broadcast %110 : vector<1x1xf32> to vector<16x1xf32>
    %112 = arith.mulf %107, %111 : vector<16x1xf32>
    %c0_48 = arith.constant 0 : index
    %c0_49 = arith.constant 0 : index
    %113 = vector.load %arg6[%c0_48, %c0_49] : memref<16x1xf32, #tpu.memory_space<vmem>>, vector<16x1xf32>
    tpu.vector_store %arg6[%c0_48, %c0_49], %112 {strides = array<i32>} : memref<16x1xf32, #tpu.memory_space<vmem>>, vector<16x1xf32>,
    return
  }
  func.func @transform_0(%arg0: i32) -> (i32, i32) {
    %c0_i32 = arith.constant 0 : i32
    %c0_i32_0 = arith.constant 0 : i32
    %c0_i32_1 = arith.constant 0 : i32
    return %c0_i32, %c0_i32_0 : i32, i32
  }
  func.func @transform_1(%arg0: i32) -> (i32, i32) {
    %c0_i32 = arith.constant 0 : i32
    %c0_i32_0 = arith.constant 0 : i32
    %c0_i32_1 = arith.constant 0 : i32
    return %c0_i32, %c0_i32_0 : i32, i32
  }
  func.func @transform_2(%arg0: i32) -> (i32, i32) {
    %c0_i32 = arith.constant 0 : i32
    %c0_i32_0 = arith.constant 0 : i32
    %c0_i32_1 = arith.constant 0 : i32
    return %c0_i32, %c0_i32_0 : i32, i32
  }
  func.func @transform_3(%arg0: i32) -> (i32, i32) {
    %c0_i32 = arith.constant 0 : i32
    %c0_i32_0 = arith.constant 0 : i32
    %c0_i32_1 = arith.constant 0 : i32
    return %c0_i32, %c0_i32_0 : i32, i32
  }
  func.func @transform_4(%arg0: i32) -> (i32, i32) {
    %c0_i32 = arith.constant 0 : i32
    %c0_i32_0 = arith.constant 0 : i32
    %c0_i32_1 = arith.constant 0 : i32
    return %c0_i32, %c0_i32_0 : i32, i32
  }
  func.func @transform_5(%arg0: i32) -> (i32, i32) {
    %c0_i32 = arith.constant 0 : i32
    %c0_i32_0 = arith.constant 0 : i32
    %c0_i32_1 = arith.constant 0 : i32
    return %c0_i32, %c0_i32_0 : i32, i32
  }
}

</mosaic_0001>

<bundles_post_ra>
// kernel: my_classifier_forward.1
= control target key start
LH: loop header
LB: loop body
LE: loop exit
PB: predicated region body
PF: predicated region fallthrough
CT: control target
= control target key end

     0   :  { %v22_v0 = vlaneseq  ;;  %v506_v1 = vmov 0.0   ;;  %s507_s22 = smov 15   ;;  %s509_s23 = smov 1   ;;  %v515_v16 = vmov 0   ;;  %vm516_vm12 = vmmov 1   ;;  %s741_s0 = inlined_call_operand.vmem [shape: f32[8,256], index: 0, kind: input, shape index: {}]   ;;  %s742_s2 = inlined_call_operand.vmem [shape: f32[32,1], index: 2, kind: input, shape index: {}]   ;;  %s743_s1 = inlined_call_operand.vmem [shape: f32[32,72], index: 1, kind: input, shape index: {}]   ;;  %s744_s3 = inlined_call_operand.vmem [shape: f32[16,32], index: 3, kind: input, shape index: {}]   ;;  %s745_s4 = inlined_call_operand.vmem [shape: f32[16,1], index: 4, kind: input, shape index: {}]   ;;  %s746_s5 = inlined_call_operand.vmem [shape: f32[16,1], index: 5, kind: output, shape index: {}]  }
   0x1   :  { %235 = vmatprep.mubr.f32.mxu0 %v506_v1  ;;  %341 = vmatprep.mubr.f32.mxu1 %v506_v1  ;;  %v20_v3 = vld [vmem:[%s741_s0] sm:$0xff]  ;;  %v21_v4 = vld [vmem:[%s741_s0 + $0x8] sm:$0xff]  ;;  %s508_s0 = smov 17   ;;  %s510_s24 = smov 16   ;;  %v136_v19 = vld [vmem:[%s742_s2 + $0x10] sm:$0xff] }
   0x2   :  { %v23_v2 = vshrl.u32 %v22_v0, 7  ;;  %s511_s25 = smov 127   ;;  %s512_s26 = smov 113   ;;  %498 = vset.pattern.permute.xlu1 %v515_v16  ;;  %v134_v17 = vld [vmem:[%s742_s2] sm:$0xff]  ;;  %499 = vset.pattern.permute.xlu0 %v515_v16  ;;  %v135_v18 = vld [vmem:[%s742_s2 + $0x8] sm:$0xff]  ;;  %v137_v20 = vld [vmem:[%s742_s2 + $0x18] sm:$0xff] }
   0x3   :  { %s513_s27 = smov 112   ;;  %s514_s28 = smov 111   ;;  %v577_v21 = vand.u32 127, %v22_v0 }
   0x4   :  { %vm24_vm0 = vcmp.eq.s32.totalorder %v23_v2, 0  ;;  %vm25_vm1 = vcmp.eq.s32.totalorder %v23_v2, 1  ;;  %vm26_vm2 = vcmp.eq.s32.totalorder %v23_v2, 2 }
   0x5   :  { %v27_v5 = vsel %vm26_vm2, 0.406, %v506_v1  ;;  %v30_v6 = vsel %vm26_vm2, 4.4444447, %v506_v1  ;;  %v580_v22 = vadd.s32 128, %v577_v21  ;;  %v40_v23 = vand.u32 15, %v577_v21 }
   0x6   :  { %v28_v7 = vsel %vm25_vm1, 0.456, %v27_v5  ;;  %v31_v8 = vsel %vm25_vm1, 4.464286, %v30_v6  ;;  %vm49_vm3 = vcmp.ge.s32.totalorder %v577_v21, 16  ;;  %vm70_vm5 = vcmp.lt.s32.totalorder %v577_v21, 15 }
   0x7   :  { %v29_v9 = vsel %vm24_vm0, 0.485, %v28_v7  ;;  %v32_v10 = vsel %vm24_vm0, 4.366812, %v31_v8  ;;  %v41_v24 = vand.u32 15, %v580_v22  ;;  %vm585_vm4 = vcmp.ge.s32.totalorder %v40_v23, 1 }
   0x8   :  { %v33_v11 = vsub.f32 %v20_v3, %v29_v9  ;;  %v34_v12 = vsub.f32 %v21_v4, %v29_v9  ;;  %vm46_vm6 = vcmp.lt.s32.totalorder %v577_v21, 17  ;;  %vm83_vm8 = vcmp.lt.s32.totalorder %v577_v21, 1  ;;  %vm601_vm10 = vmand %vm49_vm3, %vm585_vm4 }
   0x9   :  { %vm591_vm7 = vcmp.ge.s32.totalorder %v41_v24, 1  ;;  %vm61_vm9 = vcmp.lt.s32.totalorder %v577_v21, 16  ;;  %vm605_vm11 = vcmp.lt.s32.totalorder %v41_v24, 15  ;;  %vm620_vm14 = vcmp.lt.s32.totalorder %v40_v23, 15  ;;  %vm632_vm15 = vmpackc.low %vm49_vm3, %vm601_vm10 }
   0xa   :  { %v557_v13 = vmul.f32 %v33_v11, %v32_v10  ;;  %v559_v14 = vmul.f32 %v34_v12, %v32_v10  ;;  %vm616_vm13 = vmpackc.low %vm516_vm12, %vm591_vm7  ;;  %vm92_vm0 = vcmp.lt.s32.totalorder %v577_v21, 127 }
   0xb   :  { %vm427_vm1 = vmpackc.low %vm591_vm7, %vm605_vm11 }
   0xc   :  { %v473_v15 = vpack.i.bf16 %v559_v14, %v557_v13  ;;  %vm645_vm2 = vmand %vm49_vm3, %vm620_vm14  ;;  %vm105_vm3 = vcmp.lt.s32.totalorder %v580_v22, 240 }
   0xd   :  { %vm107_vm10 = vmand %vm105_vm3, %vm591_vm7  ;;  %vm123_vm7 = vcmp.lt.s32.totalorder %v577_v21, 111 }
   0xe   :  { %474 = vrot.lane.b32.xlu1 %v473_v15, %s507_s22  ;;  %464 = vrot.lane.b32.xlu0 %v473_v15, %s508_s0 }
  0x12   :  { %479 = vrot.lane.b32.xlu1 %v473_v15, %s509_s23  ;;  %469 = vrot.lane.b32.xlu0 %v473_v15, %s510_s24 }
  0x16   :  { %484 = vrot.lane.b32.xlu0 %v473_v15, %s511_s25  ;;  %489 = vrot.lane.b32.xlu1 %v473_v15, %s512_s26 }
  0x1a   :  { %494 = vrot.lane.b32.xlu0 %v473_v15, %s513_s27  ;;  %119 = vrot.lane.b32.xlu1 %v557_v13, %s514_s28 }
  0x1e   :  { %121 = vrot.lane.b32.xlu0 %v559_v14, %s514_s28  ;;  %140 = vperm.xlu1 %498, %v134_v17   ;;  %v130_v17 = vld [vmem:[%s743_s1] sm:$0xff] }
  0x22   :  { %145 = vperm.xlu0 %499, %v135_v18   ;;  %150 = vperm.xlu1 %498, %v136_v19   ;;  %v131_v18 = vld [vmem:[%s743_s1 + $0x8] sm:$0xff]  ;;  %v132_v19 = vld [vmem:[%s743_s1 + $0x10] sm:$0xff] }
  0x26   :  { %155 = vperm.xlu1 %498, %v137_v20   ;;  %v133_v20 = vld [vmem:[%s743_s1 + $0x18] sm:$0xff] }
  0x80   :  { %v475_v25 = vpop.permute.xlu1 %474  ;;  %v465_v26 = vpop.permute.xlu0 %464 }
  0x81   :  { %v477_v28 = vunpack.i.h.bf16 %v475_v25  ;;  %v476_v29 = vunpack.i.l.bf16 %v475_v25  ;;  %v467_v30 = vunpack.i.h.bf16 %v465_v26  ;;  %v466_v31 = vunpack.i.l.bf16 %v465_v26 }
  0x83   :  { %v71_v41 = vsel %vm70_vm5, %v476_v29, %v477_v28  ;;  %v47_v42 = vsel %vm46_vm6, %v466_v31, %v467_v30  ;;  %v48_v47 = vsel %vm46_vm6, %v467_v30, %v466_v31  ;;  %v72_v59 = vsel %vm70_vm5, %v477_v28, %v476_v29  ;;  %vm430_vm5 = vmpackc.low %vm585_vm4, %vm645_vm2 }
  0x84   :  { %v480_v33 = vpop.permute.xlu1 %479  ;;  %v470_v34 = vpop.permute.xlu0 %469  ;;  %vm101_vm6 = vcmp.lt.s32.totalorder %v577_v21, 113  ;;  %vm158_vm2 = vcmask 588800  }
  0x85   :  { %v482_v37 = vunpack.i.h.bf16 %v480_v33  ;;  %v481_v38 = vunpack.i.l.bf16 %v480_v33  ;;  %v472_v39 = vunpack.i.h.bf16 %v470_v34  ;;  %v471_v40 = vunpack.i.l.bf16 %v470_v34 }
  0x87   :  { %v84_v45 = vsel %vm83_vm8, %v481_v38, %v482_v37  ;;  %v62_v46 = vsel %vm61_vm9, %v471_v40, %v472_v39  ;;  %v63_v48 = vsel %vm61_vm9, %v472_v39, %v471_v40  ;;  %v85_v60 = vsel %vm83_vm8, %v482_v37, %v481_v38  ;;  %vm433_vm9 = vmpackc.low %vm605_vm11, %vm516_vm12 }
  0x88   :  { %v420_v50 = vpack.c.bf16 %v62_v46, %v47_v42  ;;  %v423_v51 = vpack.c.bf16 %v63_v48, %v48_v47  ;;  %v485_v52 = vpop.permute.xlu0 %484  ;;  %v490_v53 = vpop.permute.xlu1 %489  ;;  %v426_v61 = vpack.c.bf16 %v84_v45, %v71_v41  ;;  %vm114_vm8 = vcmp.lt.s32.totalorder %v577_v21, 112 }
  0x89   :  { %v487_v54 = vunpack.i.h.bf16 %v485_v52  ;;  %v486_v55 = vunpack.i.l.bf16 %v485_v52  ;;  %v492_v57 = vunpack.i.h.bf16 %v490_v53  ;;  %v491_v58 = vunpack.i.l.bf16 %v490_v53  ;;  %v268_v53 = vld [vmem:[%s744_s3] sm:$0xff] }
  0x8a   :  { %422 = vmatprep.subr.msk.bf16.mxu0 %vm616_vm13, %v420_v50  ;;  %v429_v3 = vpack.c.bf16 %v85_v60, %v72_v59  ;;  %vm436_vm13 = vmpackc.low %vm620_vm14, %vm516_vm12 }
  0x8b   :  { %425 = vmatpush1.bf16.msk.msra.mxu0 %vm632_vm15, %v423_v51  ;;  %v94_v62 = vsel %vm92_vm0, %v487_v54, %v486_v55  ;;  %v93_v63 = vsel %vm92_vm0, %v486_v55, %v487_v54  ;;  %v103_v4 = vsel %vm101_vm6, %v492_v57, %v491_v58  ;;  %v102_v9 = vsel %vm101_vm6, %v491_v58, %v492_v57  ;;  %vm439_vm15 = vmpackc.low %vm105_vm3, %vm107_vm10  ;;  %v269_v54 = vld [vmem:[%s744_s3 + $0x8] sm:$0xff] }
  0x8c   :  { %v432_v0 = vpack.c.bf16 %v94_v62, %v559_v14  ;;  %428 = vmatprep.subr.msk.bf16.mxu0 %vm427_vm1, %v426_v61  ;;  %v495_v2 = vpop.permute.xlu0 %494  ;;  %v435_v7 = vpack.c.bf16 %v93_v63, %v557_v13  ;;  %v120_v12 = vpop.permute.xlu1 %119  ;;  %vm442_vm0 = vmpackc.low %vm516_vm12, %vm585_vm4  ;;  %vm270_vm4 = vcmask 261120   ;;  %v362_v63 = vld [vmem:[%s745_s4] sm:$0xff] }
  0x8d   :  { %v497_v5 = vunpack.i.h.bf16 %v495_v2  ;;  %v496_v6 = vunpack.i.l.bf16 %v495_v2  ;;  %vm127_vm1 = vmand %vm105_vm3, %vm605_vm11  ;;  %vm366_vm11 = vcmask 7168  }
  0x8f   :  { %431 = vmatpush1.bf16.msk.msra.mxu0 %vm430_vm5, %v429_v3  ;;  %v116_v8 = vsel %vm114_vm8, %v497_v5, %v496_v6  ;;  %v115_v10 = vsel %vm114_vm8, %v496_v6, %v497_v5 }
  0x90   :  { %v438_v11 = vpack.c.bf16 %v116_v8, %v103_v4  ;;  %434 = vmatprep.subr.msk.bf16.mxu0 %vm433_vm9, %v432_v0  ;;  %v122_v14 = vpop.permute.xlu0 %121  ;;  %v441_v13 = vpack.c.bf16 %v115_v10, %v102_v9 }
  0x91   :  { %v125_v15 = vsel %vm123_vm7, %v122_v14, %v120_v12  ;;  %v124_v16 = vsel %vm123_vm7, %v120_v12, %v122_v14 }
  0x93   :  { %437 = vmatpush1.bf16.msk.msra.mxu0 %vm436_vm13, %v435_v7 }
  0x94   :  { %440 = vmatprep.subr.msk.bf16.mxu0 %vm439_vm15, %v438_v11 }
  0x97   :  { %443 = vmatpush1.bf16.msk.msra.mxu0 %vm442_vm0, %v441_v13 }
  0x98   :  { %412 = vmatprep.subr.msk.mxu0 %vm127_vm1, %v125_v15 }
  0x9b   :  { %413 = vmatpush1.msk.msra.mxu0 %vm620_vm14, %v124_v16 }
  0x9c   :  { %414 = vmatmul.mubr.msk.f32.vlgmr.msra.gmra.mrb[0].mxu0 %vm158_vm2, %v130_v17 }
  0x9d   :  { %241 = vmatprep.mubr.f32.mxu0 %v506_v1  ;;  %v141_v21 = vpop.permute.xlu1 %140 }
  0xa0   :  { %415 = vmatmul.mubr.msk.f32.gmra.mrb[2].mxu0 %vm158_vm2, %v131_v18 }
  0xa1   :  { %247 = vmatprep.mubr.f32.mxu0 %v506_v1  ;;  %v146_v24 = vpop.permute.xlu0 %145  ;;  %v151_v30 = vpop.permute.xlu1 %150 }
  0xa4   :  { %416 = vmatmul.mubr.msk.f32.gmra.mrb[4].mxu0 %vm158_vm2, %v132_v19 }
  0xa5   :  { %253 = vmatprep.mubr.f32.mxu0 %v506_v1  ;;  %v156_v41 = vpop.permute.xlu1 %155 }
  0xa8   :  { %417 = vmatmul.mubr.msk.f32.gmra.mrb[6].mxu0 %vm158_vm2, %v133_v20 }
 0x16f   :  { %v237_v22 = vpop.f32.mrb[0].mxu0 }
 0x170   :  { %v239_v23 = vpop.f32.mrb[1].mxu0  ;;  %v238_v25 = vadd.f32 %v237_v22, %v141_v21 }
 0x171   :  { %v240_v26 = vadd.f32 %v239_v23, %v141_v21 }
 0x172   :  { %v260_v32 = vmax.f32 %v238_v25, 0.0 }
 0x173   :  { %v243_v27 = vpop.f32.mrb[2].mxu0  ;;  %v261_v34 = vmax.f32 %v240_v26, 0.0 }
 0x174   :  { %v244_v28 = vadd.f32 %v243_v27, %v146_v24  ;;  %v245_v29 = vpop.f32.mrb[3].mxu0 }
 0x175   :  { %v246_v31 = vadd.f32 %v245_v29, %v146_v24 }
 0x176   :  { %v262_v33 = vmax.f32 %v244_v28, 0.0 }
 0x177   :  { %v263_v35 = vmax.f32 %v246_v31, 0.0  ;;  %v249_v36 = vpop.f32.mrb[4].mxu0 }
 0x178   :  { %v251_v37 = vpop.f32.mrb[5].mxu0  ;;  %v446_v38 = vpack.c.bf16 %v262_v33, %v260_v32  ;;  %v250_v40 = vadd.f32 %v249_v36, %v151_v30 }
 0x179   :  { %v444_v39 = vpack.c.bf16 %v263_v35, %v261_v34  ;;  %v252_v42 = vadd.f32 %v251_v37, %v151_v30 }
 0x17a   :  { %v264_v47 = vmax.f32 %v250_v40, 0.0 }
 0x17b   :  { %v255_v43 = vpop.f32.mrb[6].mxu0  ;;  %445 = vmatprep.subr.bf16.mxu1 %v444_v39  ;;  %v265_v49 = vmax.f32 %v252_v42, 0.0 }
 0x17c   :  { %v256_v44 = vadd.f32 %v255_v43, %v156_v41  ;;  %v257_v45 = vpop.f32.mrb[7].mxu0  ;;  %447 = vmatpush1.bf16.msra.mxu1 %v446_v38 }
 0x17d   :  { %v258_v46 = vadd.f32 %v257_v45, %v156_v41 }
 0x17e   :  { %v266_v48 = vmax.f32 %v256_v44, 0.0 }
 0x17f   :  { %v267_v50 = vmax.f32 %v258_v46, 0.0 }
 0x180   :  { %v450_v51 = vpack.c.bf16 %v266_v48, %v264_v47 }
 0x181   :  { %v448_v52 = vpack.c.bf16 %v267_v50, %v265_v49 }
 0x183   :  { %449 = vmatprep.subr.bf16.mxu1 %v448_v52 }
 0x184   :  { %451 = vmatpush1.bf16.msra.mxu1 %v450_v51 }
 0x187   :  { %418 = vmatmul.mubr.msk.f32.vlgmr.msra.gmra.mrb[0].mxu1 %vm270_vm4, %v268_v53 }
 0x188   :  { %347 = vmatprep.mubr.f32.mxu1 %v506_v1  ;;  %v363_v1 = vld [vmem:[%s745_s4 + $0x8] sm:$0xff] }
 0x18b   :  { %419 = vmatmul.mubr.msk.f32.gmra.mrb[2].mxu1 %vm270_vm4, %v269_v54 }
 0x25a   :  { %v343_v55 = vpop.f32.mrb[0].mxu1 }
 0x25b   :  { %v345_v56 = vpop.f32.mrb[1].mxu1 }
 0x25c   :  { %v354_v57 = vadd.f32 %v345_v56, %v343_v55 }
 0x25e   :  { %355 = vadd.xlane.f32.xlu0 %v354_v57  ;;  %v349_v58 = vpop.f32.mrb[2].mxu1 }
 0x25f   :  { %v351_v59 = vpop.f32.mrb[3].mxu1 }
 0x260   :  { %v357_v60 = vadd.f32 %v351_v59, %v349_v58 }
 0x262   :  { %358 = vadd.xlane.f32.xlu1 %v357_v60 }
 0x2eb   :  { %v356_v61 = vpop.xlane.xlu0 %355 }
 0x2ec   :  { %v360_v62 = vmul.f32 0.00390625, %v356_v61 }
 0x2ee   :  { %v364_v2 = vadd.f32 %v362_v63, %v360_v62 }
 0x2ef   :  { %v359_v0 = vpop.xlane.xlu1 %358 }
 0x2f0   :  { %v361_v3 = vmul.f32 0.00390625, %v359_v0  ;;  %v367_v5 = vsel %vm366_vm11, %v364_v2, -inf }
 0x2f2   :  { %v365_v4 = vadd.f32 %v363_v1, %v361_v3 }
 0x2f4   :  { %v368_v6 = vsel %vm366_vm11, %v365_v4, -inf }
 0x2f5   :  { %v369_v7 = vmax.f32 %v367_v5, %v368_v6 }
 0x2f7   :  { %v370_v8 = vrot.slane %v369_v7, 4 }
 0x2f9   :  { %v371_v9 = vmax.f32 %v369_v7, %v370_v8 }
 0x2fb   :  { %v372_v10 = vrot.slane %v371_v9, 2 }
 0x2fd   :  { %v373_v11 = vmax.f32 %v371_v9, %v372_v10 }
 0x2ff   :  { %v374_v12 = vrot.slane %v373_v11, 1 }
 0x301   :  { %v375_v14 = vmax.f32 %v373_v11, %v374_v12 }
 0x303   :  { %v376_v13 = vsub.f32 %v364_v2, %v375_v14  ;;  %v377_v15 = vsub.f32 %v365_v4, %v375_v14 }
 0x305   :  { %v378_v16 = vmul.f32 1.442695, %v376_v13  ;;  %v380_v17 = vmul.f32 1.442695, %v377_v15 }
 0x307   :  { %500 = vpow2.f32 %v378_v16 }
 0x308   :  { %502 = vpow2.f32 %v380_v17 }
 0x311   :  { %v501_v18 = vpop.eup %500 }
 0x312   :  { %v503_v19 = vpop.eup %502  ;;  %v382_v20 = vsel %vm366_vm11, %v501_v18, 0.0 }
 0x313   :  { %v383_v21 = vsel %vm366_vm11, %v503_v19, 0.0 }
 0x314   :  { %v384_v22 = vadd.f32 %v383_v21, %v382_v20 }
 0x316   :  { %v385_v23 = vrot.slane %v384_v22, 4 }
 0x318   :  { %v386_v24 = vadd.f32 %v385_v23, %v384_v22 }
 0x31a   :  { %v387_v25 = vrot.slane %v386_v24, 2 }
 0x31c   :  { %v388_v26 = vadd.f32 %v387_v25, %v386_v24 }
 0x31e   :  { %v389_v27 = vrot.slane %v388_v26, 1 }
 0x320   :  { %v390_v28 = vadd.f32 %v389_v27, %v388_v26 }
 0x322   :  { %504 = vrcp.f32 %v390_v28 }
 0x32c   :  { %v505_v29 = vpop.eup %504 }
 0x32d   :  { %v392_v30 = vmul.f32 %v505_v29, %v501_v18  ;;  %v393_v31 = vmul.f32 %v505_v29, %v503_v19 }
 0x32f   :  { %394 = vst.msk [vmem:[%s746_s5] sm:$0xff] %vm366_vm11, %v392_v30  ;;  %395 = vst.msk [vmem:[%s746_s5 + $0x8] sm:$0xff] %vm366_vm11, %v393_v31 }

</bundles_post_ra>
